<compile_context>
chip_gen: v7x
topology: tpu7x:2x2x1
jax: 0.10.0
libtpu: 0.0.40
codegen_flags: <defaults>
</compile_context>

<pallas_src>
import functools

import jax
import jax.numpy as jnp
from jax import lax
from jax.experimental import pallas as pl
from jax.experimental.pallas import tpu as pltpu


def _round_up(x, m):
    return ((x + m - 1) // m) * m


def _pick_chunk(hw):
    for cand in (512, 256, 128):
        if hw % cand == 0:
            return cand
    return hw  # full-extent block is always legal


def _l1_gather_kernel(preds_ref, idx_ref, tgt_ref, out_ref, acc_ref,
                      *, chunk, inv_denom):
    """One grid step = one (C, chunk) slice of preds along the flattened H*W axis.

    preds_ref: VMEM (C, chunk)     native-layout prediction slice.
    idx_ref  : VMEM (1, K_pad)     int32 flat spatial indices (-1 = padding).
    tgt_ref  : VMEM (C, K_pad)     f32 targets (zero in padded columns).
    out_ref  : VMEM (1, 1)         f32 reduced loss.
    acc_ref  : VMEM (C, K_pad) f32 gathered-prediction accumulator.
    """
    j = pl.program_id(0)

    @pl.when(j == 0)
    def _init():
        acc_ref[...] = jnp.zeros_like(acc_ref)

    k_pad = idx_ref.shape[1]
    # Global row index of every position in this chunk, broadcast over K lanes.
    pos = lax.broadcasted_iota(jnp.int32, (chunk, k_pad), 0) + j * chunk
    # One-hot gather matrix: column kk has a single 1 at row idx[kk] - j*chunk
    # when that index falls inside this chunk; padded (-1) indices never match.
    onehot = (pos == idx_ref[...]).astype(preds_ref.dtype)
    acc_ref[...] += jnp.dot(preds_ref[...], onehot,
                            preferred_element_type=jnp.float32)

    @pl.when(j == pl.num_programs(0) - 1)
    def _finalize():
        diff = jnp.abs(acc_ref[...] - tgt_ref[...])
        out_ref[...] = jnp.sum(diff, keepdims=True) * inv_denom


def l1_loss(preds, targets, mask, reduction="mean"):
    """Pallas TPU forward of the L1Loss module.

    preds  : (C, H, W) float predictions (native dtype preserved).
    targets: (K, C)    float targets.
    mask   : (K, 2)    int spatial indices, row = (y, x).
    """
    if reduction not in ("mean", "sum"):
        # TODO(synk): reduction='none' (per-element (K, C) output) not implemented.
        raise NotImplementedError(f"unsupported reduction: {reduction}")

    c, h, w = preds.shape
    k = int(targets.shape[0])
    hw = h * w

    if k == 0:
        # Matches PyTorch: mean over an empty tensor is NaN, sum is 0.
        return jnp.float32(jnp.nan) if reduction == "mean" else jnp.float32(0.0)

    chunk = _pick_chunk(hw)
    k_pad = _round_up(k, 128)

    # Flat spatial index per sampled point; padded lanes get -1 (never matched).
    # NOTE: out-of-range indices gather 0 here instead of raising like PyTorch.
    flat_idx = mask[:, 0].astype(jnp.int32) * w + mask[:, 1].astype(jnp.int32)
    idx_row = jnp.full((1, k_pad), -1, jnp.int32).at[0, :k].set(flat_idx)

    # Native layout: reshape only (no transpose, no dtype copy of the big tensor).
    preds_flat = preds.reshape(c, hw)
    # Targets are tiny (K*C); transpose + pad them instead of preds.
    tgt_t = jnp.zeros((c, k_pad), jnp.float32).at[:, :k].set(
        targets.T.astype(jnp.float32))

    inv_denom = 1.0 / float(k * c) if reduction == "mean" else 1.0
    kernel = functools.partial(_l1_gather_kernel, chunk=chunk,
                               inv_denom=inv_denom)

    loss = pl.pallas_call(
        kernel,
        out_shape=jax.ShapeDtypeStruct((1, 1), jnp.float32),
        grid_spec=pltpu.PrefetchScalarGridSpec(
            num_scalar_prefetch=0,
            grid=(hw // chunk,),
            in_specs=[
                pl.BlockSpec((c, chunk), lambda j: (0, j)),   # streamed preds tiles
                pl.BlockSpec((1, k_pad), lambda j: (0, 0)),   # resident indices
                pl.BlockSpec((c, k_pad), lambda j: (0, 0)),   # resident targets
            ],
            out_specs=pl.BlockSpec((1, 1), lambda j: (0, 0)),
            scratch_shapes=[pltpu.VMEM((c, k_pad), jnp.float32)],
        ),
        compiler_params=pltpu.CompilerParams(
            dimension_semantics=("arbitrary",),   # chunk axis is a reduction
        ),
    )(preds_flat, idx_row, tgt_t)
    return loss[0, 0]


def _reference_l1_loss(preds, targets, mask, reduction="mean"):
    pred = preds[:, mask[:, 0], mask[:, 1]].T.astype(jnp.float32)   # (K, C)
    diff = jnp.abs(pred - targets.astype(jnp.float32))
    return diff.mean() if reduction == "mean" else diff.sum()


if __name__ == "__main__":
    key = jax.random.PRNGKey(0)
    k1, k2, k3, k4 = jax.random.split(key, 4)

    # HW=1024 -> chunk=512 -> grid=(2,) exercises the cross-chunk accumulation.
    C, H, W, K = 4, 32, 32, 8
    preds = jax.random.normal(k1, (C, H, W), dtype=jnp.float32)
    ys = jax.random.randint(k2, (K, 1), 0, H, dtype=jnp.int32)
    xs = jax.random.randint(k3, (K, 1), 0, W, dtype=jnp.int32)
    mask = jnp.concatenate([ys, xs], axis=1)                     # (K, 2) indices
    targets = jax.random.normal(k4, (K, C), dtype=jnp.float32)

    out = jax.block_until_ready(l1_loss(preds, targets, mask, reduction="mean"))
    ref = _reference_l1_loss(preds, targets, mask, reduction="mean")
    assert jnp.allclose(out, ref, rtol=1e-5, atol=1e-6), (out, ref)

    out_s = jax.block_until_ready(l1_loss(preds, targets, mask, reduction="sum"))
    ref_s = _reference_l1_loss(preds, targets, mask, reduction="sum")
    assert jnp.allclose(out_s, ref_s, rtol=1e-5, atol=1e-5), (out_s, ref_s)

    print("KERNEL_OK")
</pallas_src>

<mosaic_0001>
module attributes {stable_mosaic.version = 11 : i64} {
  func.func @_l1_gather_kernel(%arg0: i32, %arg1: memref<4x512xf32, #tpu.memory_space<vmem>>, %arg2: memref<1x128xi32, #tpu.memory_space<vmem>>, %arg3: memref<4x128xf32, #tpu.memory_space<vmem>>, %arg4: memref<1x1xf32, #tpu.memory_space<vmem>>, %arg5: memref<4x128xf32, #tpu.memory_space<vmem>>) attributes {dimension_semantics = [#tpu.dimension_semantics<arbitrary>], iteration_bounds = array<i64: 2>, scalar_prefetch = 0 : i64, scratch_operands = 1 : i64, tpu.core_type = #tpu.core_type<tc>, window_params = [{transform_indices = @transform_0, window_bounds = array<i64: 4, 512>}, {pipeline_mode = #tpu.pipeline_mode<synchronous>, transform_indices = @transform_1, window_bounds = array<i64: 1, 128>}, {pipeline_mode = #tpu.pipeline_mode<synchronous>, transform_indices = @transform_2, window_bounds = array<i64: 4, 128>}, {pipeline_mode = #tpu.pipeline_mode<synchronous>, transform_indices = @transform_3, window_bounds = array<i64: 1, 1>}]} {
    %c0_i32 = arith.constant 0 : i32
    %0 = arith.cmpi eq, %arg0, %c0_i32 : i32
    %1 = arith.extui %0 : i1 to i32
    %c0_i32_0 = arith.constant 0 : i32
    %2 = arith.cmpi ne, %1, %c0_i32_0 : i32
    scf.if %2 {
      %cst_9 = arith.constant 0.000000e+00 : f32
      %20 = vector.broadcast %cst_9 : f32 to vector<4x128xf32>
      %c0_10 = arith.constant 0 : index
      %c0_11 = arith.constant 0 : index
      %21 = vector.load %arg5[%c0_10, %c0_11] : memref<4x128xf32, #tpu.memory_space<vmem>>, vector<4x128xf32>
      tpu.vector_store %arg5[%c0_10, %c0_11], %20 {strides = array<i32>} : memref<4x128xf32, #tpu.memory_space<vmem>>, vector<4x128xf32>,
    } else {
    }
    %3 = tpu.iota {dimensions = array<i32: 0>} : vector<512x128xi32>
    %c512_i32 = arith.constant 512 : i32
    %4 = arith.muli %arg0, %c512_i32 : i32
    %5 = vector.broadcast %4 : i32 to vector<512x128xi32>
    %6 = arith.addi %3, %5 : vector<512x128xi32>
    %c0 = arith.constant 0 : index
    %c0_1 = arith.constant 0 : index
    %7 = vector.load %arg2[%c0, %c0_1] : memref<1x128xi32, #tpu.memory_space<vmem>>, vector<1x128xi32>
    %8 = vector.broadcast %7 : vector<1x128xi32> to vector<512x128xi32>
    %9 = arith.cmpi eq, %6, %8 : vector<512x128xi32>
    %10 = arith.extui %9 : vector<512x128xi1> to vector<512x128xi32>
    %11 = arith.sitofp %10 : vector<512x128xi32> to vector<512x128xf32>
    %c0_2 = arith.constant 0 : index
    %c0_3 = arith.constant 0 : index
    %12 = vector.load %arg5[%c0_2, %c0_3] : memref<4x128xf32, #tpu.memory_space<vmem>>, vector<4x128xf32>
    %c0_4 = arith.constant 0 : index
    %c0_5 = arith.constant 0 : index
    %13 = vector.load %arg1[%c0_4, %c0_5] : memref<4x512xf32, #tpu.memory_space<vmem>>, vector<4x512xf32>
    %cst = arith.constant dense<0.000000e+00> : vector<4x128xf32>
    %14 = tpu.matmul %13, %11, %cst {dimension_numbers = #tpu.dot_dimension_numbers<[1], [0], [0], [1], [0, 0, 1, 1], [], []>} : vector<4x512xf32>, vector<512x128xf32>, vector<4x128xf32> -> vector<4x128xf32>
    %15 = arith.addf %12, %14 : vector<4x128xf32>
    %c0_6 = arith.constant 0 : index
    %c0_7 = arith.constant 0 : index
    %16 = vector.load %arg5[%c0_6, %c0_7] : memref<4x128xf32, #tpu.memory_space<vmem>>, vector<4x128xf32>
    tpu.vector_store %arg5[%c0_6, %c0_7], %15 {strides = array<i32>} : memref<4x128xf32, #tpu.memory_space<vmem>>, vector<4x128xf32>,
    %c1_i32 = arith.constant 1 : i32
    %17 = arith.cmpi eq, %arg0, %c1_i32 : i32
    %18 = arith.extui %17 : i1 to i32
    %c0_i32_8 = arith.constant 0 : i32
    %19 = arith.cmpi ne, %18, %c0_i32_8 : i32
    scf.if %19 {
      %c0_9 = arith.constant 0 : index
      %c0_10 = arith.constant 0 : index
      %20 = vector.load %arg5[%c0_9, %c0_10] : memref<4x128xf32, #tpu.memory_space<vmem>>, vector<4x128xf32>
      %c0_11 = arith.constant 0 : index
      %c0_12 = arith.constant 0 : index
      %21 = vector.load %arg3[%c0_11, %c0_12] : memref<4x128xf32, #tpu.memory_space<vmem>>, vector<4x128xf32>
      %22 = arith.subf %20, %21 : vector<4x128xf32>
      %23 = math.absf %22 : vector<4x128xf32>
      %24 = vector.shape_cast %23 : vector<4x128xf32> to vector<1x4x128xf32>
      %cst_13 = arith.constant dense<0.000000e+00> : vector<1xf32>
      %25 = vector.multi_reduction <add>, %24, %cst_13 [1, 2] : vector<1x4x128xf32> to vector<1xf32>
      %26 = vector.shape_cast %25 : vector<1xf32> to vector<1x1x1xf32>
      %27 = vector.extract %26[0, 0, 0] : f32 from vector<1x1x1xf32>
      %28 = vector.broadcast %27 : f32 to vector<1x1xf32>
      %cst_14 = arith.constant 3.125000e-02 : f32
      %29 = vector.broadcast %cst_14 : f32 to vector<1x1xf32>
      %30 = arith.mulf %28, %29 : vector<1x1xf32>
      %c0_15 = arith.constant 0 : index
      %c0_16 = arith.constant 0 : index
      %31 = vector.load %arg4[%c0_15, %c0_16] : memref<1x1xf32, #tpu.memory_space<vmem>>, vector<1x1xf32>
      tpu.vector_store %arg4[%c0_15, %c0_16], %30 {strides = array<i32>} : memref<1x1xf32, #tpu.memory_space<vmem>>, vector<1x1xf32>,
    } else {
    }
    return
  }
  func.func @transform_0(%arg0: i32) -> (i32, i32) {
    %c0_i32 = arith.constant 0 : i32
    %c0_i32_0 = arith.constant 0 : i32
    return %c0_i32, %arg0 : i32, i32
  }
  func.func @transform_1(%arg0: i32) -> (i32, i32) {
    %c0_i32 = arith.constant 0 : i32
    %c0_i32_0 = arith.constant 0 : i32
    %c0_i32_1 = arith.constant 0 : i32
    return %c0_i32, %c0_i32_0 : i32, i32
  }
  func.func @transform_2(%arg0: i32) -> (i32, i32) {
    %c0_i32 = arith.constant 0 : i32
    %c0_i32_0 = arith.constant 0 : i32
    %c0_i32_1 = arith.constant 0 : i32
    return %c0_i32, %c0_i32_0 : i32, i32
  }
  func.func @transform_3(%arg0: i32) -> (i32, i32) {
    %c0_i32 = arith.constant 0 : i32
    %c0_i32_0 = arith.constant 0 : i32
    %c0_i32_1 = arith.constant 0 : i32
    return %c0_i32, %c0_i32_0 : i32, i32
  }
}

</mosaic_0001>

<bundles_post_ra>
// kernel: tpu_custom_call.1
= control target key start
LH: loop header
LB: loop body
LE: loop exit
PB: predicated region body
PF: predicated region fallthrough
CT: control target
= control target key end

     0   :  { %8 = vsyncpa [#allocation4], 0  ;;  %s1595_s0 = inlined_call_operand.hbm [shape: f32[4,1024], index: 0, kind: input, shape index: {}]   ;;  %s1596_s1 = inlined_call_operand.vmem [shape: s32[1,128], index: 1, kind: input, shape index: {}]   ;;  %s1597_s2 = inlined_call_operand.vmem [shape: f32[4,128], index: 2, kind: input, shape index: {}]   ;;  %s1598_s3 = inlined_call_operand.hbm [shape: f32[1,1], index: 3, kind: output, shape index: {}]  }
   0x1   :  { %10 = vsyncpa [#allocation4 + $0x1], 0 }
   0x2   :  { %11 = vsyncpa [#allocation5], 0  ;;  %s1191_s12 = smov 0   ;;  %s1193_s13 = smov 0  }
   0x3   :  { %s1195_s14 = smov 0   ;;  %s1197_s15 = smov 0  }
   0x4 LB: > { %s1210_s16 = sadd.s32 4294967295, %s1165_s15   ;;  %s1213_s17 = sadd.s32 1, %s1165_s15   ;;  %s1165_s15 = sphi %s1197_s15, %s1606_s15   ;;  %s1161_s14 = sphi %s1195_s14, %s1605_s14   ;;  %s1157_s13 = sphi %s1193_s13, %s1604_s13   ;;  %s1153_s12 = sphi %s1191_s12, %s1603_s12  }
   0x5   : > { %s21_s18 = ssub.s32 %s1165_s15, %s1213_s17  ;;  %s24_s19 = sadd.s32 1, %s1161_s14 }
   0x6   : > { %p22_p0 = scmp.eq.s32.totalorder %s21_s18, 0  ;;  %p31_p1 = scmp.ne.s32.totalorder %s1161_s14, %s1157_s13 }
   0x7   : > { %p32_p2 = scmp.eq.s32.totalorder %s1165_s15, 0  ;;  %p37_p3 = scmp.ne.s32.totalorder %s1157_s13, %s1153_s12 }
   0x8   : > { %s1223_s20 = scalar_select %p22_p0, %s1161_s14, %s24_s19  }
   0x9   : > { %p33_p4 = por %p32_p2, %p31_p1  ;;  %p38_p5 = scmp.eq.s32.totalorder %s1210_s16, 0 }
   0xa   : > { %p1031_p6 = scmp.lt.s32.totalorder %s1165_s15, 2  ;;  %s130_s22 = sand.u32 1, %s1161_s14  }
   0xb   : > { %p1227_p7 = por %p38_p5, %p37_p3  ;;  %s743_s23 = sshll.u32 %s130_s22, 4 }
   0xc   : > { %s884_s24 = sshll.u32 %s1165_s15, 8  ;;  %s134_s28 = scalar_lea.vmem [#allocation3], %s743_s23 }
   0xd   : > { %s1236_s27 = scalar_lea.hbm %s1595_s0, %s884_s24  ;;  %s142_s29 = sshll.u32 %s134_s28, 4  ;;  %s1238_s29 = int_to_ptr.vmem [resolvable:$true] %s142_s29 }
   0xe   : > { %p1240_p8 = pnand %p1031_p6, %p33_p4  ;;  %s131_s4 = scalar_lea.sflag [#allocation4], %s130_s22 }
   0xf   : > { %s1071_s5 = scalar_lea.hbm %s1236_s27, 256  ;;  %s1076_s8 = scalar_lea.hbm %s1595_s0, 512 }
  0x10   : > { %p1072_p11 = scmp.ne.s32.totalorder %s1236_s27, %s1071_s5  ;;  %p1073_p12 = pneg %p1240_p8 }
  0x11   : > { %p1077_p1 = scmp.lt.u32.totalorder %s1236_s27, %s1595_s0  ;;  %p1078_p2 = scmp.lt.u32.totalorder %s1076_s8, %s1071_s5 }
  0x12   : > { %p1074_p13 = pnand %p1073_p12, %p1072_p11  ;;  %p1080_p4 = scmp.lt.u32.totalorder %s1071_s5, %s1236_s27 }
  0x13   : > { %p1079_p3 = por %p1078_p2, %p1077_p1 }
  0x14   : > { %p1075_p0 = pneg %p1074_p13 }
  0x15   : > { %p1081_p5 = por %p1080_p4, %p1079_p3 }
  0x17   : > { %p1082_p6 = pnand %p1081_p5, %p1075_p0 }
  0x19   : > { %1085 = shalt.err (!%p1082_p6)
}
  0x1a   : > { %s1086_s11 = scalar_lea.vmem %s1238_s29, 256  ;;  %s1167_s12 = smov [#allocation3]  }
  0x1b   : > { %p1087_p11 = scmp.ne.s32.totalorder %s1238_s29, %s1086_s11  ;;  %s1091_s18 = sshll.u32 %s1167_s12, 4  ;;  %s1092_s18 = int_to_ptr.vmem [resolvable:$false] %s1091_s18 }
  0x1c   : > { %s1093_s19 = scalar_lea.vmem %s1092_s18, 512  ;;  %p1094_p10 = scmp.lt.s32.totalorder %s1238_s29, %s1092_s18 }
  0x1d   : > { %p1089_p13 = pnand %p1087_p11, %p1073_p12  ;;  %p1095_p1 = scmp.lt.s32.totalorder %s1093_s19, %s1086_s11 }
  0x1f   : > { %p1090_p9 = pneg %p1089_p13  ;;  %p1096_p2 = por %p1095_p1, %p1094_p10 }
  0x21   : > { %p1097_p3 = pnand %p1096_p2, %p1090_p9 }
  0x23   : > { %1100 = shalt.err (!%p1097_p3)
}
  0x24   : > { %1030 = dma.hbm_to_vmem [thread:$0]  (!%p1240_p8), %s1236_s27, 256, %s1238_s29, %s131_s4  }
  0x25   : > { %p1601_p0 = scmp.lt.s32.totalorder %s1165_s15, 3  ;;  %p1602_p4 = scmp.ge.s32.totalorder %s1165_s15, 1 }
  0x27   : > { %p148_p12 = pnand %p1602_p4, %p1601_p0 }
  0x28   : > { %s153_s22 = sand.u32 (!%p148_p12), 1, %s1157_s13  }
  0x29   : > { %151 = sbr.rel (%p148_p12) target bundleno = 581 (0x245), region = 32  ;;  %s747_s23 = sshll.u32 (!%p148_p12), %s153_s22, 4 }
  0x2a   : > { %s154_s24 = scalar_lea.sflag (!%p148_p12), [#allocation4], %s153_s22  ;;  %s157_s25 = scalar_lea.vmem (!%p148_p12), [#allocation3], %s747_s23 }
  0x30   : > { %1144 = dma.done.wait (%p1227_p7), %s154_s24, 256  }
  0x31   : > { %1146 = vsyncadd (%p1227_p7), %s154_s24, 4294967040  ;;  %p748_p9 = scmp.ne.s32.totalorder %s1210_s16, 0 }
  0x32   : > { %v1168_v0 = vmov (!%p748_p9), 0.0  }
  0x33   : > { %179 = sbr.rel (%p748_p9) target bundleno = 58 (0x3a), region = 40  ;;  %180 = vst [vmem:[#allocation2] sm:$0xf] (!%p748_p9), %v1168_v0 }
  0x3a PF: > { %v181_v1 = vlaneseq  ;;  %s749_s15 = sshll.u32 %s1210_s16, 9  ;;  %v1282_v2 = vld [vmem:[%s157_s25] sm:$0xff]  ;;  %v1286_v4 = vld [vmem:[%s157_s25 + $0x8] sm:$0xff]  ;;  %v1169_v25 = vmov 1.0|1.0   ;;  %p879_p7 = scmp.ne.s32.totalorder %s1210_s16, 1 }
  0x3b   : > { %v514_v3 = vcombine.high %v1282_v2, %v1282_v2  ;;  %v1290_v6 = vstv %s749_s15  ;;  %v515_v7 = vcombine.high %v1286_v4, %v1286_v4  ;;  %v1299_v10 = vld [vmem:[%s1596_s1] ss:$0 sm:$0xff] }
  0x3c   : > { %v1288_v5 = vshrl.u32 %v181_v1, 7 }
  0x3d   : > { %582 = vmatprep.mubr.f32.mxu0 %v514_v3  ;;  %652 = vmatprep.mubr.f32.mxu1 %v515_v7 }
  0x3e   : > { %v198_v8 = vadd.s32 128, %v1288_v5  ;;  %v199_v9 = vadd.s32 136, %v1288_v5  ;;  %v230_v11 = vadd.s32 384, %v1288_v5  ;;  %v231_v12 = vadd.s32 392, %v1288_v5 }
  0x3f   : > { %v183_v13 = vadd.s32 8, %v1288_v5  ;;  %v248_v14 = vadd.s32 %v1290_v6, %v1288_v5  ;;  %v214_v15 = vadd.s32 256, %v1288_v5  ;;  %v215_v16 = vadd.s32 264, %v1288_v5 }
  0x40   : > { %v264_v17 = vadd.s32 %v1290_v6, %v198_v8  ;;  %v265_v18 = vadd.s32 %v1290_v6, %v199_v9  ;;  %v296_v19 = vadd.s32 %v1290_v6, %v230_v11  ;;  %v297_v20 = vadd.s32 %v1290_v6, %v231_v12 }
  0x41   : > { %v249_v21 = vadd.s32 %v1290_v6, %v183_v13  ;;  %vm317_vm0 = vcmp.eq.s32.totalorder %v248_v14, %v1299_v10  ;;  %v280_v22 = vadd.s32 %v1290_v6, %v214_v15  ;;  %v281_v23 = vadd.s32 %v1290_v6, %v215_v16 }
  0x42   : > { %vm333_vm1 = vcmp.eq.s32.totalorder %v264_v17, %v1299_v10  ;;  %vm334_vm2 = vcmp.eq.s32.totalorder %v265_v18, %v1299_v10  ;;  %vm365_vm3 = vcmp.eq.s32.totalorder %v296_v19, %v1299_v10  ;;  %vm366_vm4 = vcmp.eq.s32.totalorder %v297_v20, %v1299_v10 }
  0x43   : > { %vm955_vm5 = vmpackc.low %vm334_vm2, %vm333_vm1  ;;  %vm318_vm6 = vcmp.eq.s32.totalorder %v249_v21, %v1299_v10  ;;  %vm349_vm7 = vcmp.eq.s32.totalorder %v280_v22, %v1299_v10  ;;  %vm350_vm8 = vcmp.eq.s32.totalorder %v281_v23, %v1299_v10  ;;  %v200_v24 = vadd.s32 144, %v1288_v5 }
  0x44   : > { %956 = vmatprep.subr.msk.bf16.mxu0 %vm955_vm5, %v1169_v25  ;;  %vm987_vm9 = vmpackc.low %vm366_vm4, %vm365_vm3  ;;  %v201_v26 = vadd.s32 152, %v1288_v5  ;;  %v232_v27 = vadd.s32 400, %v1288_v5  ;;  %v233_v28 = vadd.s32 408, %v1288_v5  ;;  %v184_v29 = vadd.s32 16, %v1288_v5 }
  0x45   : > { %988 = vmatprep.subr.msk.bf16.mxu1 %vm987_vm9, %v1169_v25  ;;  %vm957_vm10 = vmpackc.low %vm318_vm6, %vm317_vm0  ;;  %v266_v30 = vadd.s32 %v1290_v6, %v200_v24  ;;  %v185_v31 = vadd.s32 24, %v1288_v5  ;;  %v216_v32 = vadd.s32 272, %v1288_v5  ;;  %v217_v33 = vadd.s32 280, %v1288_v5 }
  0x46   : > { %958 = vmatpush3.bf16.msk.msra.mxu0 %vm957_vm10, %v1169_v25  ;;  %vm989_vm11 = vmpackc.low %vm350_vm8, %vm349_vm7  ;;  %v267_v34 = vadd.s32 %v1290_v6, %v201_v26  ;;  %v298_v35 = vadd.s32 %v1290_v6, %v232_v27  ;;  %v299_v36 = vadd.s32 %v1290_v6, %v233_v28  ;;  %v250_v37 = vadd.s32 %v1290_v6, %v184_v29 }
  0x47   : > { %990 = vmatpush3.bf16.msk.msra.mxu1 %vm989_vm11, %v1169_v25  ;;  %vm335_vm12 = vcmp.eq.s32.totalorder %v266_v30, %v1299_v10  ;;  %v251_v38 = vadd.s32 %v1290_v6, %v185_v31  ;;  %v282_v39 = vadd.s32 %v1290_v6, %v216_v32  ;;  %v283_v40 = vadd.s32 %v1290_v6, %v217_v33 }
  0x48   : > { %vm336_vm13 = vcmp.eq.s32.totalorder %v267_v34, %v1299_v10  ;;  %vm367_vm14 = vcmp.eq.s32.totalorder %v298_v35, %v1299_v10  ;;  %vm368_vm15 = vcmp.eq.s32.totalorder %v299_v36, %v1299_v10  ;;  %vm319_vm0 = vcmp.eq.s32.totalorder %v250_v37, %v1299_v10 }
  0x49   : > { %vm959_vm1 = vmpackc.low %vm336_vm13, %vm335_vm12  ;;  %vm320_vm2 = vcmp.eq.s32.totalorder %v251_v38, %v1299_v10  ;;  %vm351_vm3 = vcmp.eq.s32.totalorder %v282_v39, %v1299_v10  ;;  %vm352_vm4 = vcmp.eq.s32.totalorder %v283_v40, %v1299_v10  ;;  %v202_v41 = vadd.s32 160, %v1288_v5 }
  0x4a   : > { %960 = vmatprep.subr.msk.bf16.mxu0 %vm959_vm1, %v1169_v25  ;;  %vm991_vm5 = vmpackc.low %vm368_vm15, %vm367_vm14  ;;  %v203_v42 = vadd.s32 168, %v1288_v5  ;;  %v234_v43 = vadd.s32 416, %v1288_v5  ;;  %v235_v44 = vadd.s32 424, %v1288_v5  ;;  %v186_v45 = vadd.s32 32, %v1288_v5 }
  0x4b   : > { %992 = vmatprep.subr.msk.bf16.mxu1 %vm991_vm5, %v1169_v25  ;;  %vm961_vm6 = vmpackc.low %vm320_vm2, %vm319_vm0  ;;  %v268_v46 = vadd.s32 %v1290_v6, %v202_v41  ;;  %v187_v47 = vadd.s32 40, %v1288_v5  ;;  %v218_v48 = vadd.s32 288, %v1288_v5  ;;  %v219_v49 = vadd.s32 296, %v1288_v5 }
  0x4c   : > { %962 = vmatpush3.bf16.msk.msra.mxu0 %vm961_vm6, %v1169_v25  ;;  %vm993_vm7 = vmpackc.low %vm352_vm4, %vm351_vm3  ;;  %v269_v50 = vadd.s32 %v1290_v6, %v203_v42  ;;  %v300_v51 = vadd.s32 %v1290_v6, %v234_v43  ;;  %v301_v52 = vadd.s32 %v1290_v6, %v235_v44  ;;  %v252_v53 = vadd.s32 %v1290_v6, %v186_v45 }
  0x4d   : > { %994 = vmatpush3.bf16.msk.msra.mxu1 %vm993_vm7, %v1169_v25  ;;  %vm337_vm8 = vcmp.eq.s32.totalorder %v268_v46, %v1299_v10  ;;  %v253_v54 = vadd.s32 %v1290_v6, %v187_v47  ;;  %v284_v55 = vadd.s32 %v1290_v6, %v218_v48  ;;  %v285_v56 = vadd.s32 %v1290_v6, %v219_v49 }
  0x4e   : > { %vm338_vm9 = vcmp.eq.s32.totalorder %v269_v50, %v1299_v10  ;;  %vm369_vm10 = vcmp.eq.s32.totalorder %v300_v51, %v1299_v10  ;;  %vm370_vm11 = vcmp.eq.s32.totalorder %v301_v52, %v1299_v10  ;;  %vm321_vm12 = vcmp.eq.s32.totalorder %v252_v53, %v1299_v10 }
  0x4f   : > { %vm963_vm13 = vmpackc.low %vm338_vm9, %vm337_vm8  ;;  %vm322_vm14 = vcmp.eq.s32.totalorder %v253_v54, %v1299_v10  ;;  %vm353_vm15 = vcmp.eq.s32.totalorder %v284_v55, %v1299_v10  ;;  %vm354_vm0 = vcmp.eq.s32.totalorder %v285_v56, %v1299_v10  ;;  %v204_v57 = vadd.s32 176, %v1288_v5 }
  0x50   : > { %964 = vmatprep.subr.msk.bf16.mxu0 %vm963_vm13, %v1169_v25  ;;  %vm995_vm1 = vmpackc.low %vm370_vm11, %vm369_vm10  ;;  %v205_v58 = vadd.s32 184, %v1288_v5  ;;  %v236_v59 = vadd.s32 432, %v1288_v5  ;;  %v237_v60 = vadd.s32 440, %v1288_v5  ;;  %v188_v61 = vadd.s32 48, %v1288_v5 }
  0x51   : > { %996 = vmatprep.subr.msk.bf16.mxu1 %vm995_vm1, %v1169_v25  ;;  %vm965_vm2 = vmpackc.low %vm322_vm14, %vm321_vm12  ;;  %v270_v62 = vadd.s32 %v1290_v6, %v204_v57  ;;  %v189_v63 = vadd.s32 56, %v1288_v5  ;;  %v220_v0 = vadd.s32 304, %v1288_v5  ;;  %v221_v1 = vadd.s32 312, %v1288_v5 }
  0x52   : > { %966 = vmatpush3.bf16.msk.msra.mxu0 %vm965_vm2, %v1169_v25  ;;  %vm997_vm3 = vmpackc.low %vm354_vm0, %vm353_vm15  ;;  %v271_v3 = vadd.s32 %v1290_v6, %v205_v58  ;;  %v302_v7 = vadd.s32 %v1290_v6, %v236_v59  ;;  %v303_v8 = vadd.s32 %v1290_v6, %v237_v60  ;;  %v254_v9 = vadd.s32 %v1290_v6, %v188_v61 }
  0x53   : > { %998 = vmatpush3.bf16.msk.msra.mxu1 %vm997_vm3, %v1169_v25  ;;  %vm339_vm4 = vcmp.eq.s32.totalorder %v270_v62, %v1299_v10  ;;  %v255_v11 = vadd.s32 %v1290_v6, %v189_v63  ;;  %v286_v12 = vadd.s32 %v1290_v6, %v220_v0  ;;  %v287_v13 = vadd.s32 %v1290_v6, %v221_v1 }
  0x54   : > { %vm340_vm5 = vcmp.eq.s32.totalorder %v271_v3, %v1299_v10  ;;  %vm371_vm6 = vcmp.eq.s32.totalorder %v302_v7, %v1299_v10  ;;  %vm372_vm7 = vcmp.eq.s32.totalorder %v303_v8, %v1299_v10  ;;  %vm323_vm8 = vcmp.eq.s32.totalorder %v254_v9, %v1299_v10 }
  0x55   : > { %vm967_vm9 = vmpackc.low %vm340_vm5, %vm339_vm4  ;;  %vm324_vm10 = vcmp.eq.s32.totalorder %v255_v11, %v1299_v10  ;;  %vm355_vm11 = vcmp.eq.s32.totalorder %v286_v12, %v1299_v10  ;;  %vm356_vm12 = vcmp.eq.s32.totalorder %v287_v13, %v1299_v10  ;;  %v206_v14 = vadd.s32 192, %v1288_v5 }
  0x56   : > { %968 = vmatprep.subr.msk.bf16.mxu0 %vm967_vm9, %v1169_v25  ;;  %vm999_vm13 = vmpackc.low %vm372_vm7, %vm371_vm6  ;;  %v207_v15 = vadd.s32 200, %v1288_v5  ;;  %v238_v16 = vadd.s32 448, %v1288_v5  ;;  %v239_v17 = vadd.s32 456, %v1288_v5  ;;  %v190_v18 = vadd.s32 64, %v1288_v5 }
  0x57   : > { %1000 = vmatprep.subr.msk.bf16.mxu1 %vm999_vm13, %v1169_v25  ;;  %vm969_vm14 = vmpackc.low %vm324_vm10, %vm323_vm8  ;;  %v272_v19 = vadd.s32 %v1290_v6, %v206_v14  ;;  %v191_v20 = vadd.s32 72, %v1288_v5  ;;  %v222_v21 = vadd.s32 320, %v1288_v5  ;;  %v223_v22 = vadd.s32 328, %v1288_v5 }
  0x58   : > { %970 = vmatpush3.bf16.msk.msra.mxu0 %vm969_vm14, %v1169_v25  ;;  %vm1001_vm15 = vmpackc.low %vm356_vm12, %vm355_vm11  ;;  %v273_v23 = vadd.s32 %v1290_v6, %v207_v15  ;;  %v304_v24 = vadd.s32 %v1290_v6, %v238_v16  ;;  %v305_v26 = vadd.s32 %v1290_v6, %v239_v17  ;;  %v256_v27 = vadd.s32 %v1290_v6, %v190_v18 }
  0x59   : > { %1002 = vmatpush3.bf16.msk.msra.mxu1 %vm1001_vm15, %v1169_v25  ;;  %vm341_vm0 = vcmp.eq.s32.totalorder %v272_v19, %v1299_v10  ;;  %v257_v28 = vadd.s32 %v1290_v6, %v191_v20  ;;  %v288_v29 = vadd.s32 %v1290_v6, %v222_v21  ;;  %v289_v30 = vadd.s32 %v1290_v6, %v223_v22 }
  0x5a   : > { %vm342_vm1 = vcmp.eq.s32.totalorder %v273_v23, %v1299_v10  ;;  %vm373_vm2 = vcmp.eq.s32.totalorder %v304_v24, %v1299_v10  ;;  %vm374_vm3 = vcmp.eq.s32.totalorder %v305_v26, %v1299_v10  ;;  %vm325_vm4 = vcmp.eq.s32.totalorder %v256_v27, %v1299_v10  ;;  %v509_v23 = vld [vmem:[#allocation2] sm:$0xf] }
  0x5b   : > { %vm971_vm5 = vmpackc.low %vm342_vm1, %vm341_vm0  ;;  %vm326_vm6 = vcmp.eq.s32.totalorder %v257_v28, %v1299_v10  ;;  %vm357_vm7 = vcmp.eq.s32.totalorder %v288_v29, %v1299_v10  ;;  %vm358_vm8 = vcmp.eq.s32.totalorder %v289_v30, %v1299_v10  ;;  %v208_v31 = vadd.s32 208, %v1288_v5 }
  0x5c   : > { %972 = vmatprep.subr.msk.bf16.mxu0 %vm971_vm5, %v1169_v25  ;;  %vm1003_vm9 = vmpackc.low %vm374_vm3, %vm373_vm2  ;;  %v209_v32 = vadd.s32 216, %v1288_v5  ;;  %v240_v33 = vadd.s32 464, %v1288_v5  ;;  %v241_v34 = vadd.s32 472, %v1288_v5  ;;  %v192_v35 = vadd.s32 80, %v1288_v5 }
  0x5d   : > { %1004 = vmatprep.subr.msk.bf16.mxu1 %vm1003_vm9, %v1169_v25  ;;  %vm973_vm10 = vmpackc.low %vm326_vm6, %vm325_vm4  ;;  %v274_v36 = vadd.s32 %v1290_v6, %v208_v31  ;;  %v193_v37 = vadd.s32 88, %v1288_v5  ;;  %v224_v38 = vadd.s32 336, %v1288_v5  ;;  %v225_v39 = vadd.s32 344, %v1288_v5 }
  0x5e   : > { %974 = vmatpush3.bf16.msk.msra.mxu0 %vm973_vm10, %v1169_v25  ;;  %vm1005_vm11 = vmpackc.low %vm358_vm8, %vm357_vm7  ;;  %v275_v40 = vadd.s32 %v1290_v6, %v209_v32  ;;  %v306_v41 = vadd.s32 %v1290_v6, %v240_v33  ;;  %v307_v42 = vadd.s32 %v1290_v6, %v241_v34  ;;  %v258_v43 = vadd.s32 %v1290_v6, %v192_v35 }
  0x5f   : > { %1006 = vmatpush3.bf16.msk.msra.mxu1 %vm1005_vm11, %v1169_v25  ;;  %vm343_vm12 = vcmp.eq.s32.totalorder %v274_v36, %v1299_v10  ;;  %v259_v44 = vadd.s32 %v1290_v6, %v193_v37  ;;  %v290_v45 = vadd.s32 %v1290_v6, %v224_v38  ;;  %v291_v46 = vadd.s32 %v1290_v6, %v225_v39 }
  0x60   : > { %vm344_vm13 = vcmp.eq.s32.totalorder %v275_v40, %v1299_v10  ;;  %vm375_vm14 = vcmp.eq.s32.totalorder %v306_v41, %v1299_v10  ;;  %vm376_vm15 = vcmp.eq.s32.totalorder %v307_v42, %v1299_v10  ;;  %vm327_vm0 = vcmp.eq.s32.totalorder %v258_v43, %v1299_v10 }
  0x61   : > { %vm975_vm1 = vmpackc.low %vm344_vm13, %vm343_vm12  ;;  %vm328_vm2 = vcmp.eq.s32.totalorder %v259_v44, %v1299_v10  ;;  %vm359_vm3 = vcmp.eq.s32.totalorder %v290_v45, %v1299_v10  ;;  %vm360_vm4 = vcmp.eq.s32.totalorder %v291_v46, %v1299_v10  ;;  %v210_v47 = vadd.s32 224, %v1288_v5 }
  0x62   : > { %976 = vmatprep.subr.msk.bf16.mxu0 %vm975_vm1, %v1169_v25  ;;  %vm1007_vm5 = vmpackc.low %vm376_vm15, %vm375_vm14  ;;  %v211_v48 = vadd.s32 232, %v1288_v5  ;;  %v242_v49 = vadd.s32 480, %v1288_v5  ;;  %v243_v50 = vadd.s32 488, %v1288_v5  ;;  %v194_v51 = vadd.s32 96, %v1288_v5 }
  0x63   : > { %1008 = vmatprep.subr.msk.bf16.mxu1 %vm1007_vm5, %v1169_v25  ;;  %vm977_vm6 = vmpackc.low %vm328_vm2, %vm327_vm0  ;;  %v276_v52 = vadd.s32 %v1290_v6, %v210_v47  ;;  %v195_v53 = vadd.s32 104, %v1288_v5  ;;  %v226_v54 = vadd.s32 352, %v1288_v5  ;;  %v227_v55 = vadd.s32 360, %v1288_v5 }
  0x64   : > { %978 = vmatpush3.bf16.msk.msra.mxu0 %vm977_vm6, %v1169_v25  ;;  %vm1009_vm7 = vmpackc.low %vm360_vm4, %vm359_vm3  ;;  %v277_v56 = vadd.s32 %v1290_v6, %v211_v48  ;;  %v308_v57 = vadd.s32 %v1290_v6, %v242_v49  ;;  %v309_v58 = vadd.s32 %v1290_v6, %v243_v50  ;;  %v260_v59 = vadd.s32 %v1290_v6, %v194_v51 }
  0x65   : > { %1010 = vmatpush3.bf16.msk.msra.mxu1 %vm1009_vm7, %v1169_v25  ;;  %vm345_vm8 = vcmp.eq.s32.totalorder %v276_v52, %v1299_v10  ;;  %v261_v60 = vadd.s32 %v1290_v6, %v195_v53  ;;  %v292_v61 = vadd.s32 %v1290_v6, %v226_v54  ;;  %v293_v62 = vadd.s32 %v1290_v6, %v227_v55 }
  0x66   : > { %vm346_vm9 = vcmp.eq.s32.totalorder %v277_v56, %v1299_v10  ;;  %vm377_vm10 = vcmp.eq.s32.totalorder %v308_v57, %v1299_v10  ;;  %vm378_vm11 = vcmp.eq.s32.totalorder %v309_v58, %v1299_v10  ;;  %vm329_vm12 = vcmp.eq.s32.totalorder %v260_v59, %v1299_v10 }
  0x67   : > { %vm979_vm13 = vmpackc.low %vm346_vm9, %vm345_vm8  ;;  %vm330_vm14 = vcmp.eq.s32.totalorder %v261_v60, %v1299_v10  ;;  %vm361_vm15 = vcmp.eq.s32.totalorder %v292_v61, %v1299_v10  ;;  %vm362_vm0 = vcmp.eq.s32.totalorder %v293_v62, %v1299_v10  ;;  %v212_v63 = vadd.s32 240, %v1288_v5 }
  0x68   : > { %980 = vmatprep.subr.msk.bf16.mxu0 %vm979_vm13, %v1169_v25  ;;  %vm1011_vm1 = vmpackc.low %vm378_vm11, %vm377_vm10  ;;  %v213_v0 = vadd.s32 248, %v1288_v5  ;;  %v244_v1 = vadd.s32 496, %v1288_v5  ;;  %v245_v3 = vadd.s32 504, %v1288_v5  ;;  %v196_v7 = vadd.s32 112, %v1288_v5 }
  0x69   : > { %1012 = vmatprep.subr.msk.bf16.mxu1 %vm1011_vm1, %v1169_v25  ;;  %vm981_vm2 = vmpackc.low %vm330_vm14, %vm329_vm12  ;;  %v278_v8 = vadd.s32 %v1290_v6, %v212_v63  ;;  %v197_v9 = vadd.s32 120, %v1288_v5  ;;  %v228_v11 = vadd.s32 368, %v1288_v5  ;;  %v229_v12 = vadd.s32 376, %v1288_v5 }
  0x6a   : > { %982 = vmatpush3.bf16.msk.msra.mxu0 %vm981_vm2, %v1169_v25  ;;  %vm1013_vm3 = vmpackc.low %vm362_vm0, %vm361_vm15  ;;  %v279_v13 = vadd.s32 %v1290_v6, %v213_v0  ;;  %v310_v14 = vadd.s32 %v1290_v6, %v244_v1  ;;  %v311_v15 = vadd.s32 %v1290_v6, %v245_v3  ;;  %v262_v16 = vadd.s32 %v1290_v6, %v196_v7 }
  0x6b   : > { %1014 = vmatpush3.bf16.msk.msra.mxu1 %vm1013_vm3, %v1169_v25  ;;  %vm347_vm4 = vcmp.eq.s32.totalorder %v278_v8, %v1299_v10  ;;  %v263_v5 = vadd.s32 %v1290_v6, %v197_v9  ;;  %v294_v17 = vadd.s32 %v1290_v6, %v228_v11  ;;  %v295_v18 = vadd.s32 %v1290_v6, %v229_v12 }
  0x6c   : > { %vm348_vm5 = vcmp.eq.s32.totalorder %v279_v13, %v1299_v10  ;;  %vm379_vm6 = vcmp.eq.s32.totalorder %v310_v14, %v1299_v10  ;;  %vm380_vm7 = vcmp.eq.s32.totalorder %v311_v15, %v1299_v10  ;;  %vm331_vm8 = vcmp.eq.s32.totalorder %v262_v16, %v1299_v10 }
  0x6d   : > { %vm983_vm9 = vmpackc.low %vm348_vm5, %vm347_vm4  ;;  %vm332_vm10 = vcmp.eq.s32.totalorder %v263_v5, %v1299_v10  ;;  %vm363_vm11 = vcmp.eq.s32.totalorder %v294_v17, %v1299_v10  ;;  %vm364_vm12 = vcmp.eq.s32.totalorder %v295_v18, %v1299_v10  ;;  %vm668_vm0 = vcmask (!%p879_p7), 1043456  }
  0x6e   : > { %984 = vmatprep.subr.msk.bf16.mxu0 %vm983_vm9, %v1169_v25  ;;  %vm1015_vm13 = vmpackc.low %vm380_vm7, %vm379_vm6  ;;  %vm681_vm1 = vcmask (!%p879_p7), 0  }
  0x6f   : > { %1016 = vmatprep.subr.msk.bf16.mxu1 %vm1015_vm13, %v1169_v25  ;;  %vm985_vm14 = vmpackc.low %vm332_vm10, %vm331_vm8 }
  0x70   : > { %986 = vmatpush3.bf16.msk.msra.mxu0 %vm985_vm14, %v1169_v25  ;;  %vm1017_vm15 = vmpackc.low %vm364_vm12, %vm363_vm11 }
  0x71   : > { %1018 = vmatpush3.bf16.msk.msra.mxu1 %vm1017_vm15, %v1169_v25 }
  0x73   : > { %583 = vmatmul.mubr.f32.vlgmr.msra.gmra.mrb[0].mxu0 %v1282_v2  ;;  %v665_v2 = vld [vmem:[%s1597_s2] sm:$0xf] (!%p879_p7) }
  0x74   : > { %653 = vmatmul.mubr.f32.vlgmr.msra.gmra.mrb[0].mxu1 %v1286_v4 }
 0x146   : > { %v917_v6 = vpop.f32.mrb[0].mxu0 }
 0x147   : > { %v952_v19 = vpop.f32.mrb[0].mxu1  ;;  %v918_v20 = vpop.f32.mrb[1].mxu0 }
 0x148   : > { %v919_v21 = vadd.f32 %v918_v20, %v917_v6  ;;  %v953_v10 = vpop.f32.mrb[1].mxu1 }
 0x149   : > { %v954_v22 = vadd.f32 %v953_v10, %v952_v19  ;;  %663 = sbr.rel (%p879_p7) target bundleno = 556 (0x22c), region = 44 }
 0x14b   : > { %v655_v24 = vadd.f32 %v954_v22, %v919_v21 }
 0x14d   : > { %v658_v26 = vadd.f32 %v655_v24, %v509_v23 }
 0x14f   : > { %659 = vst [vmem:[#allocation2] sm:$0xf] %v658_v26 }
 0x156   : > { %v664_v27 = vld [vmem:[#allocation2] sm:$0xf] }
 0x157   : > { %v666_v25 = vsub.f32 %v664_v27, %v665_v2 }
 0x159   : > { %v667_v4 = vand.u32 2147483647, %v666_v25 }
 0x15b   : > { %v669_v28 = vsel %vm668_vm0, %v667_v4, 0.0 }
 0x15c   : > { %670 = vadd.xlane.f32.xlu0 %v669_v28 }
 0x1e9   : > { %v671_v29 = vpop.xlane.xlu0 %670 }
 0x1ea   : > { %v672_v30 = vrot.slane %v671_v29, 4 }
 0x1ec   : > { %v673_v31 = vadd.f32 %v672_v30, %v671_v29 }
 0x1ee   : > { %v674_v32 = vrot.slane %v673_v31, 2 }
 0x1f0   : > { %v675_v33 = vadd.f32 %v674_v32, %v673_v31 }
 0x1f2   : > { %v676_v34 = vrot.slane %v675_v33, 1 }
 0x1f4   : > { %v677_v35 = vadd.f32 %v676_v34, %v675_v33 }
 0x1f6   : > { %1019 = vpush %v677_v35 }
 0x227   : > { %s1020_s29 = spop %1019 }
 0x228   : > { %v679_v36 = vstv %s1020_s29 }
 0x229   : > { %v680_v37 = vmul.f32 0.03125, %v679_v36 }
 0x22b   : > { %682 = vst.msk [vmem:[#allocation6] sm:$0x1] %vm681_vm1, %v680_v37 }
 0x22c PF: > { %p1032_p8 = scmp.eq.s32.totalorder %s1210_s16, 1  ;;  %s1170_s30 = smov [#allocation6]  }
 0x22d   : > { %s690_s4 = sshll.u32 %s1170_s30, 4  ;;  %s691_s4 = int_to_ptr.vmem [resolvable:$true] %s690_s4 }
 0x22e   : > { %s1101_s5 = scalar_lea.vmem %s691_s4, 16  ;;  %s1107_s6 = scalar_lea.vmem %s691_s4, 32 }
 0x22f   : > { %p1102_p10 = scmp.ne.s32.totalorder %s691_s4, %s1101_s5  ;;  %p1108_p11 = scmp.lt.s32.totalorder %s691_s4, %s691_s4 }
 0x230   : > { %p1109_p13 = scmp.lt.s32.totalorder %s1107_s6, %s1101_s5 }
 0x231   : > { %p1103_p5 = pnand %p1102_p10, %p1032_p8 }
 0x232   : > { %p1110_p1 = por %p1109_p13, %p1108_p11 }
 0x233   : > { %p1104_p6 = pneg %p1103_p5 }
 0x235   : > { %p1111_p2 = pnand %p1110_p1, %p1104_p6 }
 0x237   : > { %1114 = shalt.err (!%p1111_p2)
}
 0x238   : > { %s1115_s9 = scalar_lea.hbm %s1598_s3, 16 }
 0x239   : > { %p1116_p3 = scmp.ne.s32.totalorder %s1598_s3, %s1115_s9  ;;  %p1121_p12 = scmp.lt.u32.totalorder %s1115_s9, %s1598_s3 }
 0x23b   : > { %p1117_p0 = pnand %p1116_p3, %p1032_p8 }
 0x23d   : > { %p1118_p4 = pneg %p1117_p0 }
 0x23f   : > { %p1123_p9 = pnand %p1121_p12, %p1118_p4 }
 0x241   : > { %1126 = shalt.err (!%p1123_p9)
}
 0x242   : > { %1024 = dma.vmem_to_hbm [thread:$0]  (%p1032_p8), %s691_s4, 16, %s1598_s3, [#allocation5]  }
 0x243   : > { %1148 = dma.done.wait (%p1032_p8), [#allocation5], 16  }
 0x244   : > { %1150 = vsyncadd (%p1032_p8), [#allocation5], 4294967280 }
 0x245 PF: > { %p14_p7 = scmp.ge.s32.totalorder %s1213_s17, 4   ;;  %s1603_s12 = smov %s1157_s13 }
 0x246   : > { %s1604_s13 = smov %s1161_s14  ;;  %s1605_s14 = smov %s1223_s20 }
 0x247   : > { %s1606_s15 = smov %s1213_s17  ;;  %16 = sbr.rel (!%p14_p7) target bundleno = 4 (0x4), region = 77 }
 0x24e   :  { %703 = vsyncpa [#allocation4], 1 }
 0x24f   :  { %705 = vsyncpa [#allocation4 + $0x1], 1 }
 0x250   :  { %706 = vsyncpa [#allocation5], 1 }
 0x251   :  { %708 = vsyncpa [#allocation5 + $0x1], 1 }

</bundles_post_ra>
